<compile_context>
chip_gen: v6e
topology: v6e:2x2x1
jax: 0.10.0
libtpu: 0.0.40
codegen_flags: <defaults>
</compile_context>

<pallas_src>
import jax
import jax.numpy as jnp
from jax.experimental import pallas as pl
from jax.experimental.pallas import tpu as pltpu


def attention_kernel(enc_ref, prev_ref, w_enc_ref, w_prev_ref, bias_ref,
                     w_lin_ref, out_ref):
    Bt, S, D2 = enc_ref.shape
    H = w_enc_ref.shape[1]

    enc = enc_ref[...]                                           # (Bt, S, 2H)

    # Encoder projection: one MXU matmul over the whole batch tile.
    # (S = 8 keeps the (Bt, S, 2H) <-> (Bt*S, 2H) reshape sublane-aligned.)
    enc_proj = jnp.dot(enc.reshape(Bt * S, D2), w_enc_ref[...],
                       preferred_element_type=jnp.float32)       # (Bt*S, H)

    # Decoder-state projection, batched over the tile; (b_enc + b_prev) folded in.
    prev_proj = jnp.dot(prev_ref[...], w_prev_ref[...],
                        preferred_element_type=jnp.float32) + bias_ref[...]  # (Bt, H)

    # h = tanh(enc_proj + prev_proj broadcast over the sequence axis)
    h = jnp.tanh(enc_proj.reshape(Bt, S, H) + prev_proj[:, None, :])         # (Bt, S, H)

    # score[b, s] = <h[b, s, :], w_lin>  -- lane-axis reduction; the sequence
    # axis ends up on lanes for the softmax.  b_lin is a constant pre-softmax
    # shift and cancels, so it is omitted.
    score = jnp.sum(h * w_lin_ref[...], axis=-1)                             # (Bt, S)

    # Softmax over the sequence axis (native lane-axis max/sum).
    score = score - jnp.max(score, axis=-1, keepdims=True)
    e = jnp.exp(score)
    alpha = e / jnp.sum(e, axis=-1, keepdims=True)                           # (Bt, S)

    # Context: ctx[b, :] = sum_s alpha[b, s] * enc_h[b, s, :]
    ctx = jnp.sum(alpha[:, :, None] * enc, axis=1)                           # (Bt, 2H)
    out_ref[...] = ctx.astype(out_ref.dtype)


def _round_up(x, m):
    return (x + m - 1) // m * m


def attention_forward(enc_h, prev_s, params, *, max_batch_tile=256):
    B, S, D2 = enc_h.shape
    H = D2 // 2

    if prev_s.ndim == 3:                      # accept the docstring's B x 1 x H
        prev_s = prev_s.reshape(B, H)

    # Batch tiling: Bt batch rows per grid step (multiple of 8 for sublane-full
    # stores / (8,128)-friendly blocks).  Pad B up to a multiple of Bt; padded
    # rows just compute a harmless uniform softmax over zeros and are sliced
    # away at the end.  VMEM per step: ~2 * Bt*S*2H*4 bytes for enc (tiny at
    # these shapes even for v7x's 32 MiB scoped default).
    Bt = min(_round_up(B, 8), max_batch_tile)
    Bp = _round_up(B, Bt)
    if Bp != B:
        enc_h = jnp.pad(enc_h, ((0, Bp - B), (0, 0), (0, 0)))
        prev_s = jnp.pad(prev_s, ((0, Bp - B), (0, 0)))

    w_enc_t = params["w_enc"].T                               # (2H, H)
    w_prev_t = params["w_prev"].T                             # (H, H)
    bias = (params["b_enc"] + params["b_prev"]).reshape(1, H)  # folded biases
    w_lin = params["w_lin"].reshape(1, H)                     # Linear(H,1) weight row
    # params["b_lin"] is a constant pre-softmax shift -> mathematically cancels.
    # NOTE: at production sizes (S >= 512, H >= 128) cast enc / weights to bf16
    # for the MXU operands while keeping f32 accumulation and f32 tanh/softmax.

    out = pl.pallas_call(
        attention_kernel,
        out_shape=jax.ShapeDtypeStruct((Bp, D2), enc_h.dtype),
        grid_spec=pltpu.PrefetchScalarGridSpec(
            num_scalar_prefetch=0,
            grid=(Bp // Bt,),
            in_specs=[
                pl.BlockSpec((Bt, S, D2), lambda b: (b, 0, 0)),   # enc_h batch tile
                pl.BlockSpec((Bt, H), lambda b: (b, 0)),          # prev_s batch tile
                pl.BlockSpec((D2, H), lambda b: (0, 0)),          # W_enc^T (resident)
                pl.BlockSpec((H, H), lambda b: (0, 0)),           # W_prev^T (resident)
                pl.BlockSpec((1, H), lambda b: (0, 0)),           # b_enc + b_prev
                pl.BlockSpec((1, H), lambda b: (0, 0)),           # w_lin row
            ],
            out_specs=pl.BlockSpec((Bt, D2), lambda b: (b, 0)),   # lane/sublane-dense
        ),
        compiler_params=pltpu.CompilerParams(
            dimension_semantics=("parallel",)),
    )(enc_h, prev_s, w_enc_t, w_prev_t, bias, w_lin)

    return out[:B]


def attention_ref(enc_h, prev_s, params):
    """Pure-JAX reference matching the PyTorch forward exactly."""
    enc_proj = enc_h @ params["w_enc"].T + params["b_enc"]            # (B, S, H)
    prev_proj = prev_s @ params["w_prev"].T + params["b_prev"]        # (B, H)
    h = jnp.tanh(enc_proj + prev_proj[:, None, :])                    # (B, S, H)
    score = h @ params["w_lin"].T + params["b_lin"]                   # (B, S, 1)
    alpha = jax.nn.softmax(score, axis=1)                             # softmax over seq
    ctx = jnp.sum(alpha * enc_h, axis=1)                              # (B, 2H)
    return ctx


def init_params(key, hidden_dim):
    """Deterministic init mirroring nn.Linear default U(-1/sqrt(fan_in), 1/sqrt(fan_in))."""
    H = hidden_dim
    ks = jax.random.split(key, 6)

    def u(k, shape, fan_in):
        b = 1.0 / jnp.sqrt(fan_in)
        return jax.random.uniform(k, shape, jnp.float32, -b, b)

    return {
        "w_enc":  u(ks[0], (H, 2 * H), 2 * H),   # Linear(2H -> H)
        "b_enc":  u(ks[1], (H,), 2 * H),
        "w_prev": u(ks[2], (H, H), H),           # Linear(H -> H)
        "b_prev": u(ks[3], (H,), H),
        "w_lin":  u(ks[4], (1, H), H),           # Linear(H -> 1)
        "b_lin":  u(ks[5], (1,), H),
    }


if __name__ == "__main__":
    B, S, H = 2, 8, 32

    key = jax.random.PRNGKey(0)
    k_enc, k_prev, k_param = jax.random.split(key, 3)

    enc_h = jax.random.normal(k_enc, (B, S, 2 * H), jnp.float32)
    prev_s = jax.random.normal(k_prev, (B, H), jnp.float32)
    params = init_params(k_param, H)

    ctx = attention_forward(enc_h, prev_s, params)
    ctx = jax.block_until_ready(ctx)

    ref = attention_ref(enc_h, prev_s, params)
    assert ctx.shape == (B, 2 * H)
    assert jnp.allclose(ctx, ref, atol=1e-5, rtol=1e-5), "mismatch vs JAX reference"

    print("KERNEL_OK")
</pallas_src>

<mosaic_0001>
module attributes {stable_mosaic.version = 11 : i64} {
  func.func @attention_kernel(%arg0: i32, %arg1: memref<8x8x64xf32, #tpu.memory_space<vmem>>, %arg2: memref<8x32xf32, #tpu.memory_space<vmem>>, %arg3: memref<64x32xf32, #tpu.memory_space<vmem>>, %arg4: memref<32x32xf32, #tpu.memory_space<vmem>>, %arg5: memref<1x32xf32, #tpu.memory_space<vmem>>, %arg6: memref<1x32xf32, #tpu.memory_space<vmem>>, %arg7: memref<8x64xf32, #tpu.memory_space<vmem>>) attributes {dimension_semantics = [#tpu.dimension_semantics<parallel>], iteration_bounds = array<i64: 1>, scalar_prefetch = 0 : i64, scratch_operands = 0 : i64, tpu.core_type = #tpu.core_type<tc>, window_params = [{transform_indices = @transform_0, window_bounds = array<i64: 8, 8, 64>}, {transform_indices = @transform_1, window_bounds = array<i64: 8, 32>}, {pipeline_mode = #tpu.pipeline_mode<synchronous>, transform_indices = @transform_2, window_bounds = array<i64: 64, 32>}, {pipeline_mode = #tpu.pipeline_mode<synchronous>, transform_indices = @transform_3, window_bounds = array<i64: 32, 32>}, {pipeline_mode = #tpu.pipeline_mode<synchronous>, transform_indices = @transform_4, window_bounds = array<i64: 1, 32>}, {pipeline_mode = #tpu.pipeline_mode<synchronous>, transform_indices = @transform_5, window_bounds = array<i64: 1, 32>}, {transform_indices = @transform_6, window_bounds = array<i64: 8, 64>}]} {
    %c0 = arith.constant 0 : index
    %c0_0 = arith.constant 0 : index
    %c0_1 = arith.constant 0 : index
    %0 = vector.load %arg1[%c0, %c0_0, %c0_1] : memref<8x8x64xf32, #tpu.memory_space<vmem>>, vector<8x8x64xf32>
    %1 = vector.shape_cast %0 : vector<8x8x64xf32> to vector<64x64xf32>
    %c0_2 = arith.constant 0 : index
    %c0_3 = arith.constant 0 : index
    %2 = vector.load %arg3[%c0_2, %c0_3] : memref<64x32xf32, #tpu.memory_space<vmem>>, vector<64x32xf32>
    %cst = arith.constant dense<0.000000e+00> : vector<64x32xf32>
    %3 = tpu.matmul %1, %2, %cst {dimension_numbers = #tpu.dot_dimension_numbers<[1], [0], [0], [1], [0, 0, 1, 1], [], []>} : vector<64x64xf32>, vector<64x32xf32>, vector<64x32xf32> -> vector<64x32xf32>
    %c0_4 = arith.constant 0 : index
    %c0_5 = arith.constant 0 : index
    %4 = vector.load %arg2[%c0_4, %c0_5] : memref<8x32xf32, #tpu.memory_space<vmem>>, vector<8x32xf32>
    %c0_6 = arith.constant 0 : index
    %c0_7 = arith.constant 0 : index
    %5 = vector.load %arg4[%c0_6, %c0_7] : memref<32x32xf32, #tpu.memory_space<vmem>>, vector<32x32xf32>
    %cst_8 = arith.constant dense<0.000000e+00> : vector<8x32xf32>
    %6 = tpu.matmul %4, %5, %cst_8 {dimension_numbers = #tpu.dot_dimension_numbers<[1], [0], [0], [1], [0, 0, 1, 1], [], []>} : vector<8x32xf32>, vector<32x32xf32>, vector<8x32xf32> -> vector<8x32xf32>
    %c0_9 = arith.constant 0 : index
    %c0_10 = arith.constant 0 : index
    %7 = vector.load %arg5[%c0_9, %c0_10] : memref<1x32xf32, #tpu.memory_space<vmem>>, vector<1x32xf32>
    %8 = vector.broadcast %7 : vector<1x32xf32> to vector<8x32xf32>
    %9 = arith.addf %6, %8 : vector<8x32xf32>
    %10 = vector.shape_cast %3 : vector<64x32xf32> to vector<8x8x32xf32>
    %11 = vector.shape_cast %9 : vector<8x32xf32> to vector<8x1x32xf32>
    %12 = vector.broadcast %11 : vector<8x1x32xf32> to vector<8x8x32xf32>
    %13 = arith.addf %10, %12 : vector<8x8x32xf32>
    %14 = math.tanh %13 : vector<8x8x32xf32>
    %c0_11 = arith.constant 0 : index
    %c0_12 = arith.constant 0 : index
    %15 = vector.load %arg6[%c0_11, %c0_12] : memref<1x32xf32, #tpu.memory_space<vmem>>, vector<1x32xf32>
    %16 = vector.shape_cast %15 : vector<1x32xf32> to vector<1x1x32xf32>
    %17 = vector.broadcast %16 : vector<1x1x32xf32> to vector<8x8x32xf32>
    %18 = arith.mulf %14, %17 : vector<8x8x32xf32>
    %cst_13 = arith.constant dense<0.000000e+00> : vector<8x8xf32>
    %19 = vector.multi_reduction <add>, %18, %cst_13 [2] : vector<8x8x32xf32> to vector<8x8xf32>
    %cst_14 = arith.constant dense<0xFF800000> : vector<8xf32>
    %20 = vector.multi_reduction <maximumf>, %19, %cst_14 [1] : vector<8x8xf32> to vector<8xf32>
    %21 = vector.shape_cast %20 : vector<8xf32> to vector<8x1xf32>
    %22 = vector.broadcast %21 : vector<8x1xf32> to vector<8x8xf32>
    %23 = arith.subf %19, %22 : vector<8x8xf32>
    %24 = math.exp %23 : vector<8x8xf32>
    %cst_15 = arith.constant dense<0.000000e+00> : vector<8xf32>
    %25 = vector.multi_reduction <add>, %24, %cst_15 [1] : vector<8x8xf32> to vector<8xf32>
    %26 = vector.shape_cast %25 : vector<8xf32> to vector<8x1xf32>
    %27 = vector.broadcast %26 : vector<8x1xf32> to vector<8x8xf32>
    %28 = arith.divf %24, %27 : vector<8x8xf32>
    %29 = vector.shape_cast %28 : vector<8x8xf32> to vector<8x8x1xf32>
    %30 = vector.broadcast %29 : vector<8x8x1xf32> to vector<8x8x64xf32>
    %31 = arith.mulf %30, %0 : vector<8x8x64xf32>
    %cst_16 = arith.constant dense<0.000000e+00> : vector<8x64xf32>
    %32 = vector.multi_reduction <add>, %31, %cst_16 [1] : vector<8x8x64xf32> to vector<8x64xf32>
    %c0_17 = arith.constant 0 : index
    %c0_18 = arith.constant 0 : index
    %33 = vector.load %arg7[%c0_17, %c0_18] : memref<8x64xf32, #tpu.memory_space<vmem>>, vector<8x64xf32>
    tpu.vector_store %arg7[%c0_17, %c0_18], %32 {strides = array<i32>} : memref<8x64xf32, #tpu.memory_space<vmem>>, vector<8x64xf32>,
    return
  }
  func.func @transform_0(%arg0: i32) -> (i32, i32, i32) {
    %c0_i32 = arith.constant 0 : i32
    %c0_i32_0 = arith.constant 0 : i32
    %c0_i32_1 = arith.constant 0 : i32
    return %arg0, %c0_i32, %c0_i32_0 : i32, i32, i32
  }
  func.func @transform_1(%arg0: i32) -> (i32, i32) {
    %c0_i32 = arith.constant 0 : i32
    %c0_i32_0 = arith.constant 0 : i32
    return %arg0, %c0_i32 : i32, i32
  }
  func.func @transform_2(%arg0: i32) -> (i32, i32) {
    %c0_i32 = arith.constant 0 : i32
    %c0_i32_0 = arith.constant 0 : i32
    %c0_i32_1 = arith.constant 0 : i32
    return %c0_i32, %c0_i32_0 : i32, i32
  }
  func.func @transform_3(%arg0: i32) -> (i32, i32) {
    %c0_i32 = arith.constant 0 : i32
    %c0_i32_0 = arith.constant 0 : i32
    %c0_i32_1 = arith.constant 0 : i32
    return %c0_i32, %c0_i32_0 : i32, i32
  }
  func.func @transform_4(%arg0: i32) -> (i32, i32) {
    %c0_i32 = arith.constant 0 : i32
    %c0_i32_0 = arith.constant 0 : i32
    %c0_i32_1 = arith.constant 0 : i32
    return %c0_i32, %c0_i32_0 : i32, i32
  }
  func.func @transform_5(%arg0: i32) -> (i32, i32) {
    %c0_i32 = arith.constant 0 : i32
    %c0_i32_0 = arith.constant 0 : i32
    %c0_i32_1 = arith.constant 0 : i32
    return %c0_i32, %c0_i32_0 : i32, i32
  }
  func.func @transform_6(%arg0: i32) -> (i32, i32) {
    %c0_i32 = arith.constant 0 : i32
    %c0_i32_0 = arith.constant 0 : i32
    return %arg0, %c0_i32 : i32, i32
  }
}

</mosaic_0001>

<bundles_post_ra>
// kernel: tpu_custom_call.1
= control target key start
LH: loop header
LB: loop body
LE: loop exit
PB: predicated region body
PF: predicated region fallthrough
CT: control target
= control target key end

     0   :  { %11 = vsyncpa [#allocation3], 0  ;;  %s1272_s0 = inlined_call_operand.vmem [shape: f32[8,8,64], index: 0, kind: input, shape index: {}]   ;;  %s1273_s1 = inlined_call_operand.hbm [shape: f32[8,32], index: 1, kind: input, shape index: {}]   ;;  %s1274_s2 = inlined_call_operand.vmem [shape: f32[64,32], index: 2, kind: input, shape index: {}]   ;;  %s1275_s3 = inlined_call_operand.vmem [shape: f32[32,32], index: 3, kind: input, shape index: {}]   ;;  %s1276_s4 = inlined_call_operand.vmem [shape: f32[1,32], index: 4, kind: input, shape index: {}]   ;;  %s1277_s5 = inlined_call_operand.vmem [shape: f32[1,32], index: 5, kind: input, shape index: {}]   ;;  %s1278_s6 = inlined_call_operand.hbm [shape: f32[8,64], index: 6, kind: output, shape index: {}]  }
   0x1   :  { %12 = vsyncpa [#allocation4], 0  ;;  %s978_s21 = smov [#allocation2]  }
   0x2   :  { %s21_s22 = sshll.u32 %s978_s21, 4  ;;  %s22_s22 = int_to_ptr.vmem [resolvable:$true] %s21_s22 }
   0x3   :  { %s942_s23 = scalar_lea.vmem %s22_s22, 128  ;;  %p947_p1 = scmp.lt.s32.totalorder %s22_s22, %s22_s22 }
   0x4   :  { %p943_p0 = scmp.ne.s32.totalorder %s22_s22, %s942_s23  ;;  %p948_p2 = scmp.lt.s32.totalorder %s942_s23, %s942_s23 }
   0x6   :  { %p949_p3 = por %p948_p2, %p947_p1 }
   0x8   :  { %p950_p4 = pnand %p949_p3, %p943_p0 }
   0xa   :  { %953 = shalt.err (!%p950_p4)
}
   0xb   :  { %24 = dma.hbm_to_vmem [thread:$0]  %s1273_s1, 128, %s22_s22, [#allocation3]  }
   0xc   :  { %974 = dma.done.wait [#allocation3], 128  }
   0xd   :  { %975 = vsyncadd [#allocation3], 4294967168  ;;  %v979_v0 = vmov 0.0   ;;  %vm980_vm0 = vmmov 0   ;;  %v51_v1 = vld [vmem:[%s1274_s2 + $0x38] sm:$0xff]  ;;  %v50_v3 = vld [vmem:[%s1274_s2 + $0x30] sm:$0xff]  ;;  %v273_v24 = vlaneseq }
   0xe   :  { %867 = vmatprep.subr.mxu1 %v979_v0  ;;  %875 = vmatprep.mubr.msk.f32.mxu1 %vm980_vm0, %v979_v0  ;;  %v186_v2 = vld [vmem:[%s1275_s3 + $0x18] sm:$0xff]  ;;  %v185_v4 = vld [vmem:[%s1275_s3 + $0x10] sm:$0xff]  ;;  %v49_v5 = vld [vmem:[%s1274_s2 + $0x28] sm:$0xff]  ;;  %vm194_vm1 = vcmask 261120   ;;  %vm52_vm2 = vcmask 523264   ;;  %vm455_vm3 = vcmask 1041409  }
   0xf   :  { %839 = vmatprep.subr.mxu0 %v51_v1  ;;  %868 = vmatpush3.msra.mxu1 %v186_v2  ;;  %v184_v6 = vld [vmem:[%s1275_s3 + $0x8] sm:$0xff]  ;;  %v48_v7 = vld [vmem:[%s1274_s2 + $0x20] sm:$0xff]  ;;  %v47_v10 = vld [vmem:[%s1274_s2 + $0x18] sm:$0xff]  ;;  %v981_v22 = vmov 1966171168   ;;  %v1116_v26 = vshrl.u32 %v273_v24, 7 }
  0x10   :  { %840 = vmatpush3.msra.mxu0 %v51_v1  ;;  %869 = vmatprep.subr.mxu1 %v979_v0  ;;  %v183_v8 = vld [vmem:[%s1275_s3] sm:$0xff]  ;;  %v46_v12 = vld [vmem:[%s1274_s2 + $0x10] sm:$0xff]  ;;  %v45_v13 = vld [vmem:[%s1274_s2 + $0x8] sm:$0xff]  ;;  %v271_v23 = vunpack.c.l.s4 %v981_v22  ;;  %vm457_vm4 = vcmask 1042434   ;;  %vm459_vm5 = vcmask 1043459   ;;  %vm461_vm6 = vcmask 1044484  }
  0x11   :  { %841 = vmatprep.subr.mxu0 %v50_v3  ;;  %870 = vmatpush3.msra.mxu1 %v185_v4  ;;  %v182_v9 = vld [vmem:[#allocation2] sm:$0xff]  ;;  %v1069_v15 = vld [vmem:[%s1272_s0 + $0x8] sm:$0xff]  ;;  %v1074_v16 = vld [vmem:[%s1272_s0 + $0x10] sm:$0xff]  ;;  %v1123_v36 = vsub.s32 0, %v1116_v26  ;;  %vm463_vm7 = vcmask 1045509   ;;  %vm465_vm8 = vcmask 1046534  }
  0x12   :  { %842 = vmatpush3.msra.mxu0 %v50_v3  ;;  %871 = vmatprep.subr.mxu1 %v979_v0  ;;  %v1052_v11 = vld [vmem:[%s1272_s0] sm:$0xff]  ;;  %v1083_v17 = vld [vmem:[%s1272_s0 + $0x18] sm:$0xff]  ;;  %v1097_v19 = vld [vmem:[%s1272_s0 + $0x28] sm:$0xff]  ;;  %v272_v25 = vunpack.c.0.s8 %v271_v23  ;;  %vm467_vm9 = vcmask 1047559   ;;  %vm470_vm10 = vcmask 64512  }
  0x13   :  { %843 = vmatprep.subr.mxu0 %v49_v5  ;;  %872 = vmatpush3.msra.mxu1 %v184_v6  ;;  %v44_v14 = vld [vmem:[%s1274_s2] sm:$0xff]  ;;  %v1102_v20 = vld [vmem:[%s1272_s0 + $0x30] sm:$0xff]  ;;  %v1111_v21 = vld [vmem:[%s1272_s0 + $0x38] sm:$0xff] }
  0x14   :  { %844 = vmatpush3.msra.mxu0 %v49_v5  ;;  %873 = vmatprep.subr.mxu1 %v979_v0  ;;  %v1088_v18 = vld [vmem:[%s1272_s0 + $0x20] sm:$0xff]  ;;  %v275_v28 = vsub.s32 %v272_v25, %v1116_v26 }
  0x15   :  { %845 = vmatprep.subr.mxu0 %v48_v7  ;;  %874 = vmatpush3.msra.mxu1 %v183_v8  ;;  %v815_v27 = vld [vmem:[%s1276_s4] ss:$0 sm:$0xff] }
  0x16   :  { %846 = vmatpush3.msra.mxu0 %v48_v7  ;;  %876 = vmatmul.mubr.msk.f32.vlgmr.msra.gmra.mxu1 %vm194_vm1, %v182_v9  ;;  %v817_v6 = vld [vmem:[%s1277_s5] ss:$0 sm:$0xff]  ;;  %s983_s5 = smov [#allocation5]  }
  0x17   :  { %847 = vmatprep.subr.mxu0 %v47_v10  ;;  %855 = vmatprep.mubr.msk.f32.mxu0 %vm52_vm2, %v1052_v11  ;;  %s798_s16 = sshll.u32 %s983_s5, 4  ;;  %s799_s16 = int_to_ptr.vmem [resolvable:$true] %s798_s16 }
  0x18   :  { %848 = vmatpush3.msra.mxu0 %v47_v10  ;;  %s954_s17 = scalar_lea.vmem %s799_s16, 128  ;;  %p959_p6 = scmp.lt.s32.totalorder %s799_s16, %s799_s16 }
  0x19   :  { %849 = vmatprep.subr.mxu0 %v46_v12  ;;  %p955_p5 = scmp.ne.s32.totalorder %s799_s16, %s954_s17  ;;  %p960_p7 = scmp.lt.s32.totalorder %s954_s17, %s954_s17 }
  0x1a   :  { %850 = vmatpush3.msra.mxu0 %v46_v12 }
  0x1b   :  { %851 = vmatprep.subr.mxu0 %v45_v13  ;;  %p961_p8 = por %p960_p7, %p959_p6 }
  0x1c   :  { %852 = vmatpush3.msra.mxu0 %v45_v13 }
  0x1d   :  { %853 = vmatprep.subr.mxu0 %v44_v14  ;;  %p962_p9 = pnand %p961_p8, %p955_p5 }
  0x1e   :  { %854 = vmatpush3.msra.mxu0 %v44_v14 }
  0x1f   :  { %856 = vmatmul.mubr.msk.f32.vlgmr.msra.gmra.mxu0 %vm52_vm2, %v1069_v15 }
  0x20   :  { %858 = vmatprep.mubr.msk.f32.mxu0 %vm52_vm2, %v1074_v16 }
  0x23   :  { %859 = vmatmul.mubr.msk.f32.gmra.mxu0 %vm52_vm2, %v1083_v17 }
  0x24   :  { %861 = vmatprep.mubr.msk.f32.mxu0 %vm52_vm2, %v1088_v18 }
  0x27   :  { %862 = vmatmul.mubr.msk.f32.gmra.mxu0 %vm52_vm2, %v1097_v19 }
  0x28   :  { %864 = vmatprep.mubr.msk.f32.mxu0 %vm52_vm2, %v1102_v20 }
  0x2b   :  { %865 = vmatmul.mubr.msk.f32.gmra.mxu0 %vm52_vm2, %v1111_v21 }
  0xd6   :  { %v264_v29 = vpop.f32.mrf.mxu1 }
  0xd7   :  { %v265_v30 = vadd.f32 %v815_v27, %v264_v29 }
  0xd8   :  { %v877_v31 = vpop.f32.mrf.mxu1 }
  0xd9   :  { %v269_v32 = vcombine.high %v265_v30, %v265_v30  ;;  %v276_v33 = vrot.slane %v265_v30, %v275_v28 }
  0xdb   :  { %v283_v34 = vrot.slane %v269_v32, %v275_v28  ;;  %v284_v35 = vcombine.high %v276_v33, %v276_v33  ;;  %v292_v37 = vrot.slane %v276_v33, %v275_v28 }
  0xdd   :  { %v306_v38 = vrot.slane %v284_v35, %v275_v28  ;;  %v285_v39 = vcombine.high %v283_v34, %v283_v34  ;;  %v321_v43 = vrot.slane %v292_v37, %v1123_v36  ;;  %v314_v44 = vcombine.high %v292_v37, %v292_v37 }
  0xde   :  { %v299_v53 = vrot.slane %v283_v34, %v275_v28 }
  0xdf   :  { %v857_v40 = vpop.f32.mrf.mxu0  ;;  %v325_v41 = vrot.slane %v306_v38, %v1123_v36  ;;  %v316_v42 = vcombine.high %v306_v38, %v306_v38  ;;  %v313_v49 = vrot.slane %v285_v39, %v275_v28  ;;  %v329_v52 = vrot.slane %v314_v44, %v1123_v36 }
  0xe0   :  { %v337_v60 = vrot.slane %v299_v53, %v1123_v36  ;;  %v315_v61 = vcombine.high %v299_v53, %v299_v53 }
  0xe1   :  { %v359_v45 = vadd.f32 %v857_v40, %v325_v41  ;;  %v143_v46 = vpop.f32.mrf.mxu0  ;;  %v333_v47 = vrot.slane %v316_v42, %v1123_v36  ;;  %v341_v56 = vrot.slane %v313_v49, %v1123_v36  ;;  %v317_v57 = vcombine.high %v313_v49, %v313_v49 }
  0xe2   :  { %v358_v48 = vadd.f32 %v321_v43, %v143_v46  ;;  %v345_v3 = vrot.slane %v315_v61, %v1123_v36  ;;  %v422_v42 = vand.u32 127, %v273_v24 }
  0xe3   :  { %886 = vtanh.f32 %v359_v45  ;;  %v860_v50 = vpop.f32.mrf.mxu0  ;;  %v349_v0 = vrot.slane %v317_v57, %v1123_v36 }
  0xe4   :  { %888 = vtanh.f32 %v358_v48  ;;  %v361_v51 = vadd.f32 %v860_v50, %v333_v47  ;;  %v1146_v44 = vsub.s32 %v422_v42, %v1116_v26 }
  0xe5   :  { %v153_v54 = vpop.f32.mrf.mxu0 }
  0xe6   :  { %890 = vtanh.f32 %v361_v51  ;;  %v360_v55 = vadd.f32 %v329_v52, %v153_v54 }
  0xe7   :  { %v863_v58 = vpop.f32.mrf.mxu0 }
  0xe8   :  { %892 = vtanh.f32 %v360_v55  ;;  %v363_v59 = vadd.f32 %v863_v58, %v341_v56 }
  0xe9   :  { %v163_v62 = vpop.f32.mrf.mxu0 }
  0xea   :  { %894 = vtanh.f32 %v363_v59  ;;  %v362_v63 = vadd.f32 %v337_v60, %v163_v62 }
  0xeb   :  { %v866_v1 = vpop.f32.mrf.mxu0 }
  0xec   :  { %896 = vtanh.f32 %v362_v63  ;;  %v365_v2 = vadd.f32 %v866_v1, %v349_v0 }
  0xed   :  { %v173_v4 = vpop.f32.mrf.mxu0 }
  0xee   :  { %898 = vtanh.f32 %v365_v2  ;;  %v364_v5 = vadd.f32 %v345_v3, %v173_v4  ;;  %v982_v3 = vmov 0   ;;  %v481_v4 = vsub.s32 1, %v1116_v26 }
  0xef   :  { %885 = vset.pattern.permute.xlu0 %v982_v3  ;;  %884 = vset.pattern.permute.xlu1 %v982_v3 }
  0xf0   :  { %v887_v7 = vpop.eup %886  ;;  %900 = vtanh.f32 %v364_v5  ;;  %v485_v5 = vsub.s32 2, %v1116_v26 }
  0xf1   :  { %v889_v8 = vpop.eup %888  ;;  %v382_v9 = vmul.f32 %v887_v7, %v817_v6 }
  0xf2   :  { %v381_v13 = vmul.f32 %v889_v8, %v817_v6 }
  0xf3   :  { %v891_v10 = vpop.eup %890  ;;  %v392_v12 = vsel %vm194_vm1, %v382_v9, 0.0 }
  0xf4   :  { %393 = vadd.xlane.f32.xlu0 %v392_v12  ;;  %v384_v14 = vmul.f32 %v891_v10, %v817_v6  ;;  %v389_v28 = vsel %vm194_vm1, %v381_v13, 0.0  ;;  %v493_v12 = vsub.s32 4, %v1116_v26 }
  0xf5   :  { %v893_v22 = vpop.eup %892 }
  0xf6   :  { %v398_v23 = vsel %vm194_vm1, %v384_v14, 0.0  ;;  %v383_v25 = vmul.f32 %v893_v22, %v817_v6 }
  0xf7   :  { %v895_v27 = vpop.eup %894  ;;  %399 = vadd.xlane.f32.xlu1 %v398_v23 }
  0xf8   :  { %390 = vadd.xlane.f32.xlu0 %v389_v28  ;;  %v395_v30 = vsel %vm194_vm1, %v383_v25, 0.0  ;;  %v386_v32 = vmul.f32 %v895_v27, %v817_v6  ;;  %v497_v28 = vsub.s32 5, %v1116_v26 }
  0xf9   :  { %v897_v29 = vpop.eup %896 }
  0xfa   :  { %v385_v31 = vmul.f32 %v897_v29, %v817_v6  ;;  %v404_v37 = vsel %vm194_vm1, %v386_v32, 0.0  ;;  %v501_v32 = vsub.s32 6, %v1116_v26 }
  0xfb   :  { %v899_v33 = vpop.eup %898  ;;  %396 = vadd.xlane.f32.xlu1 %v395_v30 }
  0xfc   :  { %v401_v34 = vsel %vm194_vm1, %v385_v31, 0.0  ;;  %v388_v39 = vmul.f32 %v899_v33, %v817_v6 }
  0xfd   :  { %v901_v35 = vpop.eup %900  ;;  %402 = vadd.xlane.f32.xlu0 %v401_v34 }
  0xfe   :  { %v387_v38 = vmul.f32 %v901_v35, %v817_v6  ;;  %v410_v41 = vsel %vm194_vm1, %v388_v39, 0.0  ;;  %v489_v6 = vsub.s32 3, %v1116_v26 }
  0xff   :  { %405 = vadd.xlane.f32.xlu1 %v404_v37  ;;  %v505_v37 = vsub.s32 7, %v1116_v26 }
 0x100   :  { %v407_v40 = vsel %vm194_vm1, %v387_v38, 0.0 }
 0x101   :  { %408 = vadd.xlane.f32.xlu0 %v407_v40 }
 0x103   :  { %411 = vadd.xlane.f32.xlu1 %v410_v41 }
 0x17d   :  { %v394_v43 = vpop.xlane.xlu0 %393 }
 0x17e   :  { %v430_v48 = vrot.slane %v394_v43, %v1146_v44 }
 0x180   :  { %v400_v45 = vpop.xlane.xlu1 %399 }
 0x181   :  { %v391_v46 = vpop.xlane.xlu0 %390  ;;  %v438_v51 = vrot.slane %v400_v45, %v1146_v44 }
 0x182   :  { %v426_v47 = vrot.slane %v391_v46, %v1146_v44 }
 0x184   :  { %v397_v49 = vpop.xlane.xlu1 %396  ;;  %v456_v24 = vsel %vm455_vm3, %v430_v48, %v426_v47 }
 0x185   :  { %v434_v50 = vrot.slane %v397_v49, %v1146_v44 }
 0x186   :  { %v403_v52 = vpop.xlane.xlu0 %402 }
 0x187   :  { %v458_v53 = vsel %vm457_vm4, %v434_v50, %v456_v24  ;;  %v442_v54 = vrot.slane %v403_v52, %v1146_v44 }
 0x188   :  { %v460_v55 = vsel %vm459_vm5, %v438_v51, %v458_v53  ;;  %v406_v56 = vpop.xlane.xlu1 %405 }
 0x189   :  { %v462_v57 = vsel %vm461_vm6, %v442_v54, %v460_v55  ;;  %v446_v58 = vrot.slane %v406_v56, %v1146_v44 }
 0x18a   :  { %v409_v59 = vpop.xlane.xlu0 %408 }
 0x18b   :  { %v450_v60 = vrot.slane %v409_v59, %v1146_v44  ;;  %v464_v61 = vsel %vm463_vm7, %v446_v58, %v462_v57 }
 0x18c   :  { %v412_v62 = vpop.xlane.xlu1 %411 }
 0x18d   :  { %v454_v63 = vrot.slane %v412_v62, %v1146_v44  ;;  %v466_v0 = vsel %vm465_vm8, %v450_v60, %v464_v61 }
 0x18f   :  { %v468_v1 = vsel %vm467_vm9, %v454_v63, %v466_v0 }
 0x190   :  { %v471_v2 = vsel %vm470_vm10, %v468_v1, -inf }
 0x191   :  { %472 = vmax.xlane.f32.xlu0 %v471_v2 }
 0x21a   :  { %v473_v7 = vpop.xlane.xlu0 %472 }
 0x21b   :  { %v478_v8 = vrot.slane %v473_v7, %v1123_v36  ;;  %v482_v9 = vrot.slane %v473_v7, %v481_v4  ;;  %v486_v10 = vrot.slane %v473_v7, %v485_v5  ;;  %v490_v13 = vrot.slane %v473_v7, %v489_v6 }
 0x21c   :  { %v494_v29 = vrot.slane %v473_v7, %v493_v12  ;;  %v498_v33 = vrot.slane %v473_v7, %v497_v28  ;;  %v502_v38 = vrot.slane %v473_v7, %v501_v32  ;;  %v506_v41 = vrot.slane %v473_v7, %v505_v37 }
 0x21d   :  { %v515_v14 = vsub.f32 %v391_v46, %v478_v8  ;;  %v516_v22 = vsub.f32 %v394_v43, %v482_v9  ;;  %v517_v23 = vsub.f32 %v397_v49, %v486_v10  ;;  %v518_v30 = vsub.f32 %v400_v45, %v490_v13 }
 0x21e   :  { %v519_v34 = vsub.f32 %v403_v52, %v494_v29  ;;  %v520_v39 = vsub.f32 %v406_v56, %v498_v33  ;;  %v521_v42 = vsub.f32 %v409_v59, %v502_v38  ;;  %v522_v47 = vsub.f32 %v412_v62, %v506_v41 }
 0x21f   :  { %v523_v25 = vmul.f32 1.442695, %v515_v14  ;;  %v525_v27 = vmul.f32 1.442695, %v516_v22  ;;  %v527_v31 = vmul.f32 1.442695, %v517_v23 }
 0x220   :  { %v529_v35 = vmul.f32 1.442695, %v518_v30  ;;  %v531_v40 = vmul.f32 1.442695, %v519_v34  ;;  %v533_v43 = vmul.f32 1.442695, %v520_v39 }
 0x221   :  { %902 = vpow2.f32 %v523_v25  ;;  %v535_v48 = vmul.f32 1.442695, %v521_v42  ;;  %v537_v50 = vmul.f32 1.442695, %v522_v47 }
 0x222   :  { %904 = vpow2.f32 %v525_v27 }
 0x223   :  { %906 = vpow2.f32 %v527_v31 }
 0x224   :  { %908 = vpow2.f32 %v529_v35 }
 0x225   :  { %910 = vpow2.f32 %v531_v40 }
 0x226   :  { %912 = vpow2.f32 %v533_v43 }
 0x227   :  { %914 = vpow2.f32 %v535_v48 }
 0x228   :  { %916 = vpow2.f32 %v537_v50 }
 0x22e   :  { %v903_v45 = vpop.eup %902 }
 0x22f   :  { %v1186_v46 = vpop.eup %904  ;;  %548 = vperm.xlu1 %884, %v903_v45  }
 0x230   :  { %551 = vperm.xlu0 %885, %v1186_v46   ;;  %v1189_v49 = vpop.eup %906 }
 0x231   :  { %v1192_v51 = vpop.eup %908 }
 0x232   :  { %v1195_v24 = vpop.eup %910 }
 0x233   :  { %554 = vperm.xlu1 %884, %v1189_v49   ;;  %v1198_v52 = vpop.eup %912 }
 0x234   :  { %v1201_v53 = vpop.eup %914 }
 0x235   :  { %v1204_v54 = vpop.eup %916 }
 0x237   :  { %557 = vperm.xlu1 %884, %v1192_v51  }
 0x23b   :  { %560 = vperm.xlu1 %884, %v1195_v24  }
 0x23f   :  { %563 = vperm.xlu1 %884, %v1198_v52  }
 0x243   :  { %566 = vperm.xlu1 %884, %v1201_v53  }
 0x247   :  { %569 = vperm.xlu1 %884, %v1204_v54  }
 0x2aa   :  { %v549_v55 = vpop.permute.xlu1 %548 }
 0x2ab   :  { %v552_v59 = vpop.permute.xlu0 %551  ;;  %v574_v62 = vrot.slane %v549_v55, %v1146_v44 }
 0x2ac   :  { %v578_v61 = vrot.slane %v552_v59, %v1146_v44 }
 0x2ae   :  { %v555_v56 = vpop.permute.xlu1 %554  ;;  %v603_v3 = vsel %vm455_vm3, %v578_v61, %v574_v62 }
 0x2af   :  { %v582_v63 = vrot.slane %v555_v56, %v1146_v44 }
 0x2b1   :  { %v604_v8 = vsel %vm457_vm4, %v582_v63, %v603_v3 }
 0x2b2   :  { %v558_v57 = vpop.permute.xlu1 %557 }
 0x2b3   :  { %v586_v0 = vrot.slane %v558_v57, %v1146_v44 }
 0x2b5   :  { %v605_v10 = vsel %vm459_vm5, %v586_v0, %v604_v8 }
 0x2b6   :  { %v561_v58 = vpop.permute.xlu1 %560 }
 0x2b7   :  { %v590_v1 = vrot.slane %v561_v58, %v1146_v44 }
 0x2b9   :  { %v606_v13 = vsel %vm461_vm6, %v590_v1, %v605_v10 }
 0x2ba   :  { %v564_v60 = vpop.permute.xlu1 %563 }
 0x2bb   :  { %v594_v7 = vrot.slane %v564_v60, %v1146_v44 }
 0x2bd   :  { %v607_v22 = vsel %vm463_vm7, %v594_v7, %v606_v13 }
 0x2be   :  { %v567_v2 = vpop.permute.xlu1 %566 }
 0x2bf   :  { %v598_v9 = vrot.slane %v567_v2, %v1146_v44 }
 0x2c1   :  { %v608_v25 = vsel %vm465_vm8, %v598_v9, %v607_v22 }
 0x2c2   :  { %v570_v14 = vpop.permute.xlu1 %569 }
 0x2c3   :  { %v602_v23 = vrot.slane %v570_v14, %v1146_v44 }
 0x2c5   :  { %v609_v27 = vsel %vm467_vm9, %v602_v23, %v608_v25 }
 0x2c6   :  { %v611_v29 = vsel %vm470_vm10, %v609_v27, 0.0 }
 0x2c7   :  { %612 = vadd.xlane.f32.xlu1 %v611_v29 }
 0x350   :  { %v613_v30 = vpop.xlane.xlu1 %612 }
 0x351   :  { %v618_v31 = vrot.slane %v613_v30, %v1123_v36  ;;  %v622_v33 = vrot.slane %v613_v30, %v481_v4  ;;  %v626_v34 = vrot.slane %v613_v30, %v485_v5  ;;  %v630_v44 = vrot.slane %v613_v30, %v489_v6 }
 0x352   :  { %v634_v35 = vrot.slane %v613_v30, %v493_v12  ;;  %v638_v36 = vrot.slane %v613_v30, %v497_v28  ;;  %v642_v5 = vrot.slane %v613_v30, %v501_v32  ;;  %v646_v12 = vrot.slane %v613_v30, %v505_v37 }
 0x353   :  { %918 = vrcp.f32 %v618_v31 }
 0x354   :  { %920 = vrcp.f32 %v622_v33 }
 0x355   :  { %922 = vrcp.f32 %v626_v34 }
 0x356   :  { %924 = vrcp.f32 %v630_v44 }
 0x357   :  { %926 = vrcp.f32 %v634_v35 }
 0x358   :  { %928 = vrcp.f32 %v638_v36 }
 0x359   :  { %930 = vrcp.f32 %v642_v5 }
 0x35a   :  { %932 = vrcp.f32 %v646_v12 }
 0x360   :  { %v919_v38 = vpop.eup %918 }
 0x361   :  { %v656_v39 = vmul.f32 %v919_v38, %v903_v45  ;;  %v921_v4 = vpop.eup %920 }
 0x362   :  { %v658_v40 = vmul.f32 %v921_v4, %v1186_v46  ;;  %v923_v6 = vpop.eup %922 }
 0x363   :  { %673 = vperm.xlu0 %885, %v656_v39   ;;  %v660_v41 = vmul.f32 %v923_v6, %v1189_v49  ;;  %v925_v42 = vpop.eup %924 }
 0x364   :  { %v662_v28 = vmul.f32 %v925_v42, %v1192_v51  ;;  %v927_v43 = vpop.eup %926 }
 0x365   :  { %v664_v32 = vmul.f32 %v927_v43, %v1195_v24  ;;  %v929_v45 = vpop.eup %928 }
 0x366   :  { %v666_v46 = vmul.f32 %v929_v45, %v1198_v52  ;;  %v931_v47 = vpop.eup %930 }
 0x367   :  { %678 = vperm.xlu0 %885, %v658_v40   ;;  %v668_v26 = vmul.f32 %v931_v47, %v1201_v53  ;;  %v933_v37 = vpop.eup %932 }
 0x368   :  { %v670_v48 = vmul.f32 %v933_v37, %v1204_v54 }
 0x36b   :  { %683 = vperm.xlu0 %885, %v660_v41  }
 0x36f   :  { %688 = vperm.xlu0 %885, %v662_v28  }
 0x373   :  { %693 = vperm.xlu0 %885, %v664_v32  }
 0x377   :  { %698 = vperm.xlu0 %885, %v666_v46  }
 0x37b   :  { %703 = vperm.xlu0 %885, %v668_v26  }
 0x37f   :  { %708 = vperm.xlu0 %885, %v670_v48  }
 0x3de   :  { %v674_v49 = vpop.permute.xlu0 %673 }
 0x3df   :  { %v711_v24 = vmul.f32 %v674_v49, %v1052_v11 }
 0x3e1   :  { %v719_v53 = vsel %vm52_vm2, %v711_v24, 0.0 }
 0x3e2   :  { %v679_v50 = vpop.permute.xlu0 %678  ;;  %v720_v62 = vrot.slane %v719_v53, 4 }
 0x3e3   :  { %v712_v51 = vmul.f32 %v679_v50, %v1069_v15 }
 0x3e4   :  { %v721_v2 = vadd.f32 %v720_v62, %v719_v53 }
 0x3e5   :  { %v726_v52 = vsel %vm52_vm2, %v712_v51, 0.0 }
 0x3e6   :  { %v684_v55 = vpop.permute.xlu0 %683  ;;  %v727_v54 = vrot.slane %v726_v52, 4  ;;  %v722_v22 = vrot.slane %v721_v2, 2 }
 0x3e7   :  { %v713_v56 = vmul.f32 %v684_v55, %v1074_v16 }
 0x3e8   :  { %v728_v0 = vadd.f32 %v727_v54, %v726_v52  ;;  %v723_v44 = vadd.f32 %v722_v22, %v721_v2 }
 0x3e9   :  { %v733_v57 = vsel %vm52_vm2, %v713_v56, 0.0 }
 0x3ea   :  { %v689_v58 = vpop.permute.xlu0 %688  ;;  %v734_v60 = vrot.slane %v733_v57, 4 }
 0x3eb   :  { %v714_v59 = vmul.f32 %v689_v58, %v1083_v17  ;;  %v729_v17 = vrot.slane %v728_v0, 2 }
 0x3ec   :  { %v735_v16 = vadd.f32 %v734_v60, %v733_v57 }
 0x3ed   :  { %v740_v61 = vsel %vm52_vm2, %v714_v59, 0.0  ;;  %v730_v30 = vadd.f32 %v729_v17, %v728_v0 }
 0x3ee   :  { %v741_v15 = vrot.slane %v740_v61, 4  ;;  %v694_v63 = vpop.permute.xlu0 %693  ;;  %v736_v13 = vrot.slane %v735_v16, 2 }
 0x3ef   :  { %v715_v11 = vmul.f32 %v694_v63, %v1088_v18  ;;  %v731_v5 = vrot.slane %v730_v30, 1 }
 0x3f0   :  { %v742_v3 = vadd.f32 %v741_v15, %v740_v61  ;;  %v737_v33 = vadd.f32 %v736_v13, %v735_v16 }
 0x3f1   :  { %v747_v1 = vsel %vm52_vm2, %v715_v11, 0.0  ;;  %v732_v45 = vadd.f32 %v731_v5, %v730_v30 }
 0x3f2   :  { %v748_v7 = vrot.slane %v747_v1, 4  ;;  %v699_v8 = vpop.permute.xlu0 %698  ;;  %v743_v23 = vrot.slane %v742_v3, 2  ;;  %v738_v12 = vrot.slane %v737_v33, 1 }
 0x3f3   :  { %v716_v9 = vmul.f32 %v699_v8, %v1097_v19 }
 0x3f4   :  { %v749_v10 = vadd.f32 %v748_v7, %v747_v1  ;;  %v744_v35 = vadd.f32 %v743_v23, %v742_v3  ;;  %v739_v37 = vadd.f32 %v738_v12, %v737_v33 }
 0x3f5   :  { %v754_v14 = vsel %vm52_vm2, %v716_v9, 0.0 }
 0x3f6   :  { %v755_v25 = vrot.slane %v754_v14, 4  ;;  %v704_v27 = vpop.permute.xlu0 %703  ;;  %v750_v18 = vrot.slane %v749_v10, 2  ;;  %v745_v42 = vrot.slane %v744_v35, 1 }
 0x3f7   :  { %v717_v29 = vmul.f32 %v704_v27, %v1102_v20  ;;  %v724_v20 = vrot.slane %v723_v44, 1 }
 0x3f8   :  { %v756_v31 = vadd.f32 %v755_v25, %v754_v14  ;;  %v751_v39 = vadd.f32 %v750_v18, %v749_v10  ;;  %v746_v49 = vadd.f32 %v745_v42, %v744_v35 }
 0x3f9   :  { %v761_v34 = vsel %vm52_vm2, %v717_v29, 0.0  ;;  %v725_v48 = vadd.f32 %v724_v20, %v723_v44 }
 0x3fa   :  { %v757_v19 = vrot.slane %v756_v31, 2  ;;  %v762_v38 = vrot.slane %v761_v34, 4  ;;  %v709_v36 = vpop.permute.xlu0 %708  ;;  %v752_v32 = vrot.slane %v751_v39, 1 }
 0x3fb   :  { %v718_v4 = vmul.f32 %v709_v36, %v1111_v21  ;;  %v783_v55 = vsel %vm455_vm3, %v732_v45, %v725_v48 }
 0x3fc   :  { %v758_v40 = vadd.f32 %v757_v19, %v756_v31  ;;  %v763_v6 = vadd.f32 %v762_v38, %v761_v34  ;;  %v753_v51 = vadd.f32 %v752_v32, %v751_v39  ;;  %v784_v52 = vsel %vm457_vm4, %v739_v37, %v783_v55 }
 0x3fd   :  { %v768_v41 = vsel %vm52_vm2, %v718_v4, 0.0  ;;  %v785_v58 = vsel %vm459_vm5, %v746_v49, %v784_v52 }
 0x3fe   :  { %v764_v28 = vrot.slane %v763_v6, 2  ;;  %v769_v43 = vrot.slane %v768_v41, 4  ;;  %v759_v46 = vrot.slane %v758_v40, 1  ;;  %v786_v59 = vsel %vm461_vm6, %v753_v51, %v785_v58 }
 0x400   :  { %v765_v47 = vadd.f32 %v764_v28, %v763_v6  ;;  %v770_v26 = vadd.f32 %v769_v43, %v768_v41  ;;  %v760_v24 = vadd.f32 %v759_v46, %v758_v40 }
 0x402   :  { %v766_v50 = vrot.slane %v765_v47, 1  ;;  %v771_v21 = vrot.slane %v770_v26, 2  ;;  %v787_v60 = vsel %vm463_vm7, %v760_v24, %v786_v59 }
 0x404   :  { %v772_v56 = vadd.f32 %v771_v21, %v770_v26  ;;  %v767_v57 = vadd.f32 %v766_v50, %v765_v47 }
 0x406   :  { %v773_v53 = vrot.slane %v772_v56, 1  ;;  %v788_v61 = vsel %vm465_vm8, %v767_v57, %v787_v60 }
 0x408   :  { %v774_v54 = vadd.f32 %v773_v53, %v772_v56 }
 0x40a   :  { %v789_v62 = vsel %vm467_vm9, %v774_v54, %v788_v61 }
 0x40b   :  { %791 = vst.msk [vmem:[#allocation5] sm:$0xff] %vm52_vm2, %v789_v62 }
 0x40c   :  { %965 = shalt.err (!%p962_p9)
}
 0x40d   :  { %801 = dma.vmem_to_hbm [thread:$0]  %s799_s16, 128, %s1278_s6, [#allocation4]  }
 0x40e   :  { %976 = dma.done.wait [#allocation4], 128  }
 0x40f   :  { %977 = vsyncadd [#allocation4], 4294967168 }
 0x410   :  { %805 = vsyncpa [#allocation3], 1 }
 0x411   :  { %806 = vsyncpa [#allocation4], 1 }

</bundles_post_ra>
